<compile_context>
chip_gen: v5e
topology: v5e:2x2
jax: 0.10.0
libtpu: 0.0.40
codegen_flags: <defaults>
</compile_context>

<pallas_src>
import jax
import jax.numpy as jnp
from jax.experimental import pallas as pl
from jax.experimental.pallas import tpu as pltpu


def _round_up(x, m):
    return (x + m - 1) // m * m


def light_upsample_kernel(x_ref, w1t_ref, b1_ref, w23t_ref, b23_ref, o_ref):
    # x_ref:   (Cin,    TILE_P)   channel-major tile, P on lanes
    # w1t_ref: (Cmid,   Cin)      stage-1 weight (BN scale folded in), transposed
    # b1_ref:  (Cmid,   1)        stage-1 folded bias
    # w23t_ref:(4*Cout, Cmid)     fused convT+1x1conv+BN weight, rows = (a,b,co)
    # b23_ref: (4*Cout, 1)        fused bias
    # o_ref:   (4*Cout, TILE_P)   lane-dense output tile
    x = x_ref[...].astype(jnp.float32)

    # stage 1: 1x1 conv (+folded BN) + ReLU
    h = jnp.dot(w1t_ref[...], x, preferred_element_type=jnp.float32)
    h = jnp.maximum(h + b1_ref[...], 0.0)

    # stages 2+3 fused: ConvT(k2,s2) -> 1x1 conv (+folded BN) + ReLU
    o = jnp.dot(w23t_ref[...], h, preferred_element_type=jnp.float32)
    o = jnp.maximum(o + b23_ref[...], 0.0)

    o_ref[...] = o.astype(o_ref.dtype)


def light_upsample(x_nchw, params, tile_p=2048, out_dtype=None):
    (w1, b1c, g1, be1, m1, v1,
     wup_raw, bup_raw,
     w2, b2c, g2, be2, m2, v2) = params

    eps = 1e-5
    hp = jax.lax.Precision.HIGHEST
    N, Cin, H, W = x_nchw.shape
    Cmid = w1.shape[1]
    Cout = w2.shape[1]
    out_dtype = jnp.float32 if out_dtype is None else out_dtype

    # ---- fold BatchNorm (eval) + fuse stage 2 into stage 3 (exact algebra) ----
    s1 = g1 / jnp.sqrt(v1 + eps)
    b1f = ((b1c - m1) * s1 + be1).astype(jnp.float32).reshape(Cmid, 1)
    w1t = (w1 * s1[None, :]).T.astype(jnp.float32)                  # (Cmid, Cin)

    s2 = g2 / jnp.sqrt(v2 + eps)
    b2f = (b2c - m2) * s2 + be2
    w2eff = w2 * s2[None, :]                                        # (Cmid, Cout)
    # W23[(a,b,co), cm] = sum_d wup[cm, d, a, b] * w2eff[d, co]
    w23 = jnp.einsum('cdab,de->abec', wup_raw, w2eff, precision=hp)  # (2,2,Cout,Cmid)
    w23t = w23.reshape(4 * Cout, Cmid).astype(jnp.float32)
    b23 = jnp.einsum('d,de->e', bup_raw, w2eff, precision=hp) + b2f  # (Cout,)
    b23t = jnp.tile(b23, (4,)).reshape(4 * Cout, 1).astype(jnp.float32)

    # ---- channel-major flatten (free reshape of NCHW); pad P to the tile ----
    P = H * W
    tp = min(tile_p, _round_up(P, 128))
    Pp = _round_up(P, tp)
    x_cm = x_nchw.reshape(N, Cin, P)
    if Pp != P:
        x_cm = jnp.pad(x_cm, ((0, 0), (0, 0), (0, Pp - P)))

    grid = (N, Pp // tp)   # >= 2 steps -> both v7x TensorCores get work
    out_cm = pl.pallas_call(
        light_upsample_kernel,
        out_shape=jax.ShapeDtypeStruct((N, 4 * Cout, Pp), out_dtype),
        grid_spec=pltpu.PrefetchScalarGridSpec(
            num_scalar_prefetch=0,
            grid=grid,
            in_specs=[
                pl.BlockSpec((None, Cin, tp), lambda n, p: (n, 0, p)),
                pl.BlockSpec((Cmid, Cin), lambda n, p: (0, 0)),
                pl.BlockSpec((Cmid, 1), lambda n, p: (0, 0)),
                pl.BlockSpec((4 * Cout, Cmid), lambda n, p: (0, 0)),
                pl.BlockSpec((4 * Cout, 1), lambda n, p: (0, 0)),
            ],
            out_specs=pl.BlockSpec((None, 4 * Cout, tp), lambda n, p: (n, 0, p)),
        ),
        compiler_params=pltpu.CompilerParams(
            dimension_semantics=("parallel", "parallel")),
    )(x_cm, w1t, b1f, w23t, b23t)

    if Pp != P:
        out_cm = out_cm[:, :, :P]

    # Sub-pixel reassembly: (N, (a,b,co), H*W) -> (N, Cout, 2H, 2W).
    # This is the single remaining data-movement op (input side is transpose-free).
    o = out_cm.reshape(N, 2, 2, Cout, H, W)
    o = jnp.transpose(o, (0, 3, 4, 1, 5, 2)).reshape(N, Cout, 2 * H, 2 * W)
    return o


def reference_forward(x_nchw, params):
    """Pure-JAX reference following the PyTorch op semantics (unfused)."""
    (w1, b1c, g1, be1, m1, v1,
     wup_raw, bup_raw,
     w2, b2c, g2, be2, m2, v2) = params
    eps = 1e-5
    hp = jax.lax.Precision.HIGHEST

    x = jnp.transpose(x_nchw, (0, 2, 3, 1)).astype(jnp.float32)      # NHWC
    # stage 1: 1x1 conv + BN + ReLU
    h = jnp.einsum('nhwc,cd->nhwd', x, w1, precision=hp) + b1c
    h = jnp.maximum((h - m1) / jnp.sqrt(v1 + eps) * g1 + be1, 0.0)
    # stage 2: ConvTranspose2d k=2 s=2
    u = jnp.einsum('nhwc,cdab->nhwabd', h, wup_raw, precision=hp) + bup_raw
    N, H, W, _, _, Cmid = u.shape
    u = jnp.transpose(u, (0, 1, 3, 2, 4, 5)).reshape(N, 2 * H, 2 * W, Cmid)
    # stage 3: 1x1 conv + BN + ReLU
    o = jnp.einsum('nhwc,cd->nhwd', u, w2, precision=hp) + b2c
    o = jnp.maximum((o - m2) / jnp.sqrt(v2 + eps) * g2 + be2, 0.0)
    return jnp.transpose(o, (0, 3, 1, 2))                            # NCHW


def make_params(key, cin, cmid, cout):
    ks = jax.random.split(key, 10)
    f32 = jnp.float32
    w1 = jax.random.normal(ks[0], (cin, cmid), f32) * 0.3
    b1c = jax.random.normal(ks[1], (cmid,), f32) * 0.1
    g1 = 1.0 + 0.1 * jax.random.normal(ks[2], (cmid,), f32)
    be1 = 0.1 * jax.random.normal(ks[3], (cmid,), f32)
    m1 = 0.05 * jax.random.normal(ks[4], (cmid,), f32)
    v1 = 1.0 + 0.1 * jnp.abs(jax.random.normal(ks[5], (cmid,), f32))
    wup_raw = jax.random.normal(ks[6], (cmid, cmid, 2, 2), f32) * 0.2
    bup_raw = 0.05 * jax.random.normal(ks[7], (cmid,), f32)
    w2 = jax.random.normal(ks[8], (cmid, cout), f32) * 0.3
    b2c = 0.1 * jax.random.normal(ks[9], (cout,), f32)
    g2 = jnp.linspace(0.9, 1.1, cout, dtype=f32)
    be2 = jnp.linspace(-0.1, 0.1, cout, dtype=f32)
    m2 = jnp.linspace(-0.05, 0.05, cout, dtype=f32)
    v2 = jnp.linspace(0.9, 1.1, cout, dtype=f32)
    return (w1, b1c, g1, be1, m1, v1, wup_raw, bup_raw,
            w2, b2c, g2, be2, m2, v2)


if __name__ == "__main__":
    key = jax.random.PRNGKey(0)
    kx, kp = jax.random.split(key)

    N, Cin, H, W = 2, 4, 16, 16
    Cmid, Cout = 8, 4          # in_channels=4, mid_channels=8, out_channels=4, scale=2

    x = jax.random.normal(kx, (N, Cin, H, W), jnp.float32)
    params = make_params(kp, Cin, Cmid, Cout)

    fwd = jax.jit(lambda xx: light_upsample(xx, params))
    out = jax.block_until_ready(fwd(x))

    ref = reference_forward(x, params)
    assert out.shape == (N, Cout, 2 * H, 2 * W), out.shape
    assert jnp.allclose(out, ref, rtol=2e-3, atol=2e-3), \
        float(jnp.max(jnp.abs(out - ref)))

    print("KERNEL_OK")
</pallas_src>

<mosaic_0001>
module attributes {stable_mosaic.version = 11 : i64} {
  func.func @light_upsample_kernel(%arg0: i32, %arg1: i32, %arg2: memref<1x4x256xf32, #tpu.memory_space<vmem>>, %arg3: memref<8x4xf32, #tpu.memory_space<vmem>>, %arg4: memref<8x1xf32, #tpu.memory_space<vmem>>, %arg5: memref<16x8xf32, #tpu.memory_space<vmem>>, %arg6: memref<16x1xf32, #tpu.memory_space<vmem>>, %arg7: memref<1x16x256xf32, #tpu.memory_space<vmem>>) attributes {dimension_semantics = [#tpu.dimension_semantics<parallel>, #tpu.dimension_semantics<parallel>], iteration_bounds = array<i64: 2, 1>, scalar_prefetch = 0 : i64, scratch_operands = 0 : i64, tpu.core_type = #tpu.core_type<tc>, window_params = [{transform_indices = @transform_0, window_bounds = array<i64: 1, 4, 256>}, {pipeline_mode = #tpu.pipeline_mode<synchronous>, transform_indices = @transform_1, window_bounds = array<i64: 8, 4>}, {pipeline_mode = #tpu.pipeline_mode<synchronous>, transform_indices = @transform_2, window_bounds = array<i64: 8, 1>}, {pipeline_mode = #tpu.pipeline_mode<synchronous>, transform_indices = @transform_3, window_bounds = array<i64: 16, 8>}, {pipeline_mode = #tpu.pipeline_mode<synchronous>, transform_indices = @transform_4, window_bounds = array<i64: 16, 1>}, {transform_indices = @transform_5, window_bounds = array<i64: 1, 16, 256>}]} {
    %c0 = arith.constant 0 : index
    %c0_0 = arith.constant 0 : index
    %c0_1 = arith.constant 0 : index
    %0 = vector.load %arg2[%c0, %c0_0, %c0_1] : memref<1x4x256xf32, #tpu.memory_space<vmem>>, vector<1x4x256xf32>
    %1 = vector.shape_cast %0 : vector<1x4x256xf32> to vector<4x256xf32>
    %c0_2 = arith.constant 0 : index
    %c0_3 = arith.constant 0 : index
    %2 = vector.load %arg3[%c0_2, %c0_3] : memref<8x4xf32, #tpu.memory_space<vmem>>, vector<8x4xf32>
    %cst = arith.constant dense<0.000000e+00> : vector<8x256xf32>
    %3 = tpu.matmul %2, %1, %cst {dimension_numbers = #tpu.dot_dimension_numbers<[1], [0], [0], [1], [0, 0, 1, 1], [], []>} : vector<8x4xf32>, vector<4x256xf32>, vector<8x256xf32> -> vector<8x256xf32>
    %c0_4 = arith.constant 0 : index
    %c0_5 = arith.constant 0 : index
    %4 = vector.load %arg4[%c0_4, %c0_5] : memref<8x1xf32, #tpu.memory_space<vmem>>, vector<8x1xf32>
    %5 = vector.broadcast %4 : vector<8x1xf32> to vector<8x256xf32>
    %6 = arith.addf %3, %5 : vector<8x256xf32>
    %cst_6 = arith.constant 0.000000e+00 : f32
    %7 = vector.broadcast %cst_6 : f32 to vector<8x256xf32>
    %8 = arith.maximumf %6, %7 : vector<8x256xf32>
    %c0_7 = arith.constant 0 : index
    %c0_8 = arith.constant 0 : index
    %9 = vector.load %arg5[%c0_7, %c0_8] : memref<16x8xf32, #tpu.memory_space<vmem>>, vector<16x8xf32>
    %cst_9 = arith.constant dense<0.000000e+00> : vector<16x256xf32>
    %10 = tpu.matmul %9, %8, %cst_9 {dimension_numbers = #tpu.dot_dimension_numbers<[1], [0], [0], [1], [0, 0, 1, 1], [], []>} : vector<16x8xf32>, vector<8x256xf32>, vector<16x256xf32> -> vector<16x256xf32>
    %c0_10 = arith.constant 0 : index
    %c0_11 = arith.constant 0 : index
    %11 = vector.load %arg6[%c0_10, %c0_11] : memref<16x1xf32, #tpu.memory_space<vmem>>, vector<16x1xf32>
    %12 = vector.broadcast %11 : vector<16x1xf32> to vector<16x256xf32>
    %13 = arith.addf %10, %12 : vector<16x256xf32>
    %cst_12 = arith.constant 0.000000e+00 : f32
    %14 = vector.broadcast %cst_12 : f32 to vector<16x256xf32>
    %15 = arith.maximumf %13, %14 : vector<16x256xf32>
    %c0_13 = arith.constant 0 : index
    %c0_14 = arith.constant 0 : index
    %c0_15 = arith.constant 0 : index
    %16 = vector.load %arg7[%c0_13, %c0_14, %c0_15] : memref<1x16x256xf32, #tpu.memory_space<vmem>>, vector<1x16x256xf32>
    %17 = vector.shape_cast %16 : vector<1x16x256xf32> to vector<16x256xf32>
    %18 = vector.shape_cast %15 : vector<16x256xf32> to vector<1x16x256xf32>
    tpu.vector_store %arg7[%c0_13, %c0_14, %c0_15], %18 {strides = array<i32>} : memref<1x16x256xf32, #tpu.memory_space<vmem>>, vector<1x16x256xf32>,
    return
  }
  func.func @transform_0(%arg0: i32, %arg1: i32) -> (i32, i32, i32) {
    %c0_i32 = arith.constant 0 : i32
    %c0_i32_0 = arith.constant 0 : i32
    return %arg0, %c0_i32, %arg1 : i32, i32, i32
  }
  func.func @transform_1(%arg0: i32, %arg1: i32) -> (i32, i32) {
    %c0_i32 = arith.constant 0 : i32
    %c0_i32_0 = arith.constant 0 : i32
    %c0_i32_1 = arith.constant 0 : i32
    return %c0_i32, %c0_i32_0 : i32, i32
  }
  func.func @transform_2(%arg0: i32, %arg1: i32) -> (i32, i32) {
    %c0_i32 = arith.constant 0 : i32
    %c0_i32_0 = arith.constant 0 : i32
    %c0_i32_1 = arith.constant 0 : i32
    return %c0_i32, %c0_i32_0 : i32, i32
  }
  func.func @transform_3(%arg0: i32, %arg1: i32) -> (i32, i32) {
    %c0_i32 = arith.constant 0 : i32
    %c0_i32_0 = arith.constant 0 : i32
    %c0_i32_1 = arith.constant 0 : i32
    return %c0_i32, %c0_i32_0 : i32, i32
  }
  func.func @transform_4(%arg0: i32, %arg1: i32) -> (i32, i32) {
    %c0_i32 = arith.constant 0 : i32
    %c0_i32_0 = arith.constant 0 : i32
    %c0_i32_1 = arith.constant 0 : i32
    return %c0_i32, %c0_i32_0 : i32, i32
  }
  func.func @transform_5(%arg0: i32, %arg1: i32) -> (i32, i32, i32) {
    %c0_i32 = arith.constant 0 : i32
    %c0_i32_0 = arith.constant 0 : i32
    return %arg0, %c0_i32, %arg1 : i32, i32, i32
  }
}

</mosaic_0001>

<bundles_post_ra>
// kernel: tile.0
= control target key start
LH: loop header
LB: loop body
LE: loop exit
PB: predicated region body
PF: predicated region fallthrough
CT: control target
= control target key end

     0   :  { %s34_s8 = smov 125   ;;  %s35_s9 = smov 126   ;;  %vm7_vm0 = vcmask 7168   ;;  %s61_s0 = inlined_call_operand.vmem [shape: f32[4,4], index: 0, kind: input, shape index: {}]   ;;  %s62_s1 = inlined_call_operand.vmem [shape: f32[16,1], index: 1, kind: output, shape index: {}]  }
   0x1   :  { %v4_v0 = vld [vmem:[%s61_s0] sm:$0xf]  ;;  %s33_s0 = smov 127  }
   0x2   :  { %5 = vst [vmem:[#allocation0] sm:$0xf] %v4_v0 }
   0x9   :  { %v9_v1 = vld [vmem:[#allocation0] sm:$0xf]  }
   0xa   :  { %v21_v2 = vld [vmem:[#allocation0] sm:$0xf]   ;;  %10 = vrot.lane.b32.xlu0 %v9_v1, %s33_s0 }
   0xb   :  { %22 = vrot.lane.b32.xlu1 %v21_v2, %s34_s8  ;;  %v15_v3 = vld [vmem:[#allocation0] sm:$0xf]  }
   0xc   :  { %v6_v4 = vld [vmem:[#allocation0] sm:$0xf]  }
   0xd   :  { %8 = vst.msk [vmem:[%s62_s1] ss:$4 sm:$0xf] %vm7_vm0, %v6_v4  }
  0x12   :  { %16 = vrot.lane.b32.xlu0 %v15_v3, %s35_s9 }
  0x7c   :  { %v11_v5 = vpop.permute.xlu0 %10  }
  0x7d   :  { %v23_v6 = vpop.permute.xlu1 %22   ;;  %27 = vst.msk [vmem:[%s62_s1 + $0x1] ss:$4 sm:$0xf] %vm7_vm0, %v11_v5  }
  0x7e   :  { %29 = vst.msk [vmem:[%s62_s1 + $0x3] ss:$4 sm:$0xf] %vm7_vm0, %v23_v6  }
  0x84   :  { %v17_v7 = vpop.permute.xlu0 %16  }
  0x85   :  { %28 = vst.msk [vmem:[%s62_s1 + $0x2] ss:$4 sm:$0xf] %vm7_vm0, %v17_v7  }

// kernel: tile.8
= control target key start
LH: loop header
LB: loop body
LE: loop exit
PB: predicated region body
PF: predicated region fallthrough
CT: control target
= control target key end

     0   :  { %s22_s0 = inlined_call_operand.vmem [shape: f32[4], index: 0, kind: input, shape index: {}]   ;;  %s23_s1 = inlined_call_operand.vmem [shape: f32[4,4], index: 1, kind: output, shape index: {}]  }
   0x1   :  { %v4_v0 = vld [vmem:[%s22_s0] ss:$0 sm:$0xff] }
   0x2   :  { %5 = vst [vmem:[%s23_s1] sm:$0xf] %v4_v0 }

// kernel: _lambda_.1
= control target key start
LH: loop header
LB: loop body
LE: loop exit
PB: predicated region body
PF: predicated region fallthrough
CT: control target
= control target key end

     0   :  { %s592_s18 = smov 0   ;;  %s594_s19 = smov 0   ;;  %s647_s0 = inlined_call_operand.vmem [shape: f32[2,4,256], index: 0, kind: input, shape index: {}]   ;;  %s648_s1 = inlined_call_operand.vmem [shape: f32[8,4], index: 1, kind: input, shape index: {}]   ;;  %s649_s2 = inlined_call_operand.vmem [shape: f32[8,1], index: 2, kind: input, shape index: {}]   ;;  %s650_s3 = inlined_call_operand.vmem [shape: f32[16,8], index: 3, kind: input, shape index: {}]   ;;  %s651_s4 = inlined_call_operand.vmem [shape: f32[16,1], index: 4, kind: input, shape index: {}]   ;;  %s652_s5 = inlined_call_operand.vmem [shape: f32[2,16,256], index: 5, kind: output, shape index: {}]  }
   0x1   :  { %s596_s20 = smov 0  }
   0x2 LB: > { %s27_s21 = sadd.s32 1, %s555_s19  ;;  %p493_p0 = scmp.ge.s32.totalorder %s559_s20, 1  ;;  %s559_s20 = sphi %s596_s20, %s15_s20   ;;  %s555_s19 = sphi %s594_s19, %s654_s19   ;;  %s551_s18 = sphi %s592_s18, %s653_s18  }
   0x3   : > { %p29_p1 = scmp.ge.s32.totalorder %s27_s21, 2  ;;  %p208_p2 = scmp.lt.s32.totalorder %s559_s20, 3 }
   0x5   : > { %s656_s21 = smov (%p29_p1, %s27_s21), 0  ;;  %p209_p3 = pnand %p493_p0, %p208_p2 }
   0x6   : > { %p245_p4 = scmp.lt.s32.totalorder (!%p209_p3), %s551_s18, 1 }
   0x7   : > { %212 = sbr.rel (%p209_p3) target bundleno = 302 (0x12e), region = 40 }
   0xc   : > { %v266_v0 = vld [vmem:[%s649_s2] sm:$0xff]  ;;  %v561_v1 = vmov 0   ;;  %s658_s18 = smov (!%p245_p4, %s551_s18), 1  ;;  %vm280_vm0 = vcmask 1043456   ;;  %vm276_vm1 = vcmask 31744   ;;  %v330_v7 = vld [vmem:[%s651_s4 + $0x8] sm:$0xff] }
   0xd   : > { %535 = vset.pattern.permute.xlu0 %v561_v1  ;;  %536 = vset.pattern.permute.xlu1 %v561_v1  ;;  %s508_s24 = sshll.u32 %s658_s18, 3  ;;  %v329_v3 = vld [vmem:[%s651_s4] sm:$0xff]  ;;  %vm341_vm2 = vcmask 64512   ;;  %v328_v16 = vld [vmem:[%s650_s3 + $0x8] sm:$0xff]  ;;  %s509_s13 = sshll.u32 %s658_s18, 5 }
   0xe   : > { %269 = vperm.xlu0 %535, %v266_v0   ;;  %s252_s27 = scalar_lea.vmem %s647_s0, %s508_s24  ;;  %v265_v4 = vld [vmem:[%s648_s1] sm:$0xff]  ;;  %338 = vperm.xlu1 %536, %v330_v7   ;;  %s262_s16 = scalar_lea.vmem %s652_s5, %s509_s13 }
   0xf   : > { %v264_v2 = vld [vmem:[%s252_s27] sm:$0xff] }
  0x10   : > { %273 = vst [vmem:[#allocation1] ss:$2 sm:$0xff] %v264_v2  ;;  %v327_v15 = vld [vmem:[%s650_s3] sm:$0xff] }
  0x16   : > { %333 = vperm.xlu0 %535, %v329_v3  }
  0x17   : > { %v274_v5 = vld.sshfl [vmem:[#allocation1] sm:$0xff pattern:$0x75316420]  ;;  %v275_v6 = vld.sshfl [vmem:[#allocation1 + $0x8] sm:$0xff pattern:$0x75316420] }
  0x18   : > { %498 = vmatpush.msk.msra.mxu0 %vm280_vm0, %v274_v5  ;;  %500 = vmatpush.msk.msra.mxu1 %vm280_vm0, %v275_v6 }
  0x19   : > { %499 = vmatmul.msk.f32.vlgmr.msra.gmra.mxu0 %vm276_vm1, %v265_v4  ;;  %501 = vmatmul.msk.f32.vlgmr.msra.gmra.mxu1 %vm276_vm1, %v265_v4 }
  0x80   : > { %v270_v8 = vpop.permute.xlu0 %269  ;;  %v339_v24 = vpop.permute.xlu1 %338 }
  0x88   : > { %v334_v17 = vpop.permute.xlu0 %333 }
  0x96   : > { %v302_v9 = vpop.f32.mrf.mxu0  ;;  %v322_v10 = vpop.f32.mrf.mxu1 }
  0x97   : > { %v303_v11 = vadd.f32 %v302_v9, %v270_v8  ;;  %v323_v12 = vadd.f32 %v322_v10, %v270_v8 }
  0x99   : > { %v325_v13 = vmax.f32 %v303_v11, 0.0  ;;  %v326_v14 = vmax.f32 %v323_v12, 0.0 }
  0x9b   : > { %363 = vmatpush.msra.mxu2 %v325_v13  ;;  %386 = vmatpush.msra.mxu3 %v326_v14 }
  0x9c   : > { %502 = vmatmul.msk.f32.vlgmr.msra.gmra.mxu2 %vm341_vm2, %v327_v15  ;;  %504 = vmatmul.msk.f32.vlgmr.msra.gmra.mxu3 %vm341_vm2, %v327_v15 }
  0xa4   : > { %503 = vmatmul.msk.f32.gmra.mxu2 %vm341_vm2, %v328_v16  ;;  %505 = vmatmul.msk.f32.gmra.mxu3 %vm341_vm2, %v328_v16 }
 0x11f   : > { %v365_v18 = vpop.f32.mrf.mxu2  ;;  %v388_v19 = vpop.f32.mrf.mxu3 }
 0x120   : > { %v366_v20 = vadd.f32 %v365_v18, %v334_v17  ;;  %v389_v21 = vadd.f32 %v388_v19, %v334_v17 }
 0x122   : > { %v394_v22 = vmax.f32 %v366_v20, 0.0  ;;  %v395_v23 = vmax.f32 %v389_v21, 0.0 }
 0x124   : > { %398 = vst [vmem:[%s262_s16] sm:$0xff] %v394_v22 }
 0x125   : > { %399 = vst [vmem:[%s262_s16 + $0x8] sm:$0xff] %v395_v23 }
 0x127   : > { %v368_v25 = vpop.f32.mrf.mxu2  ;;  %v391_v26 = vpop.f32.mrf.mxu3 }
 0x128   : > { %v369_v27 = vadd.f32 %v368_v25, %v339_v24  ;;  %v392_v28 = vadd.f32 %v391_v26, %v339_v24 }
 0x12a   : > { %v396_v29 = vmax.f32 %v369_v27, 0.0  ;;  %v397_v30 = vmax.f32 %v392_v28, 0.0 }
 0x12c   : > { %400 = vst [vmem:[%s262_s16 + $0x10] sm:$0xff] %v396_v29 }
 0x12d   : > { %401 = vst [vmem:[%s262_s16 + $0x18] sm:$0xff] %v397_v30 }
 0x12e PF: > { %s15_s20 = sadd.s32 1, %s559_s20   ;;  %s653_s18 = smov %s555_s19 }
 0x12f   : > { %p12_p5 = scmp.ge.s32.totalorder %s15_s20, 4   ;;  %s654_s19 = smov %s656_s21 }
 0x131   :  { %14 = sbr.rel (!%p12_p5) target bundleno = 2 (0x2), region = 70 }

</bundles_post_ra>
